<compile_context>
chip_gen: v7x
topology: tpu7x:2x2x1
jax: 0.10.0
libtpu: 0.0.40
codegen_flags: <defaults>
</compile_context>

<pallas_src>
import functools

import jax
import jax.numpy as jnp
from jax.experimental import pallas as pl
from jax.experimental.pallas import tpu as pltpu

_LANE = 128     # lane width (last dim)
_SUBLANE = 8    # sublane width (second-to-last dim)


def _round_up(x, m):
    return (x + m - 1) // m * m


# ----------------------------------------------------------------------------
# Fused kernel: the whole FFNN in one grid step per batch tile.
# ----------------------------------------------------------------------------
def _make_ffnn_kernel(n_layers):
    def kernel(*refs):
        # refs = (x_ref, w_0..w_{L-1}, b_0..b_{L-1}, o_ref); no scratch.
        x_ref = refs[0]
        w_refs = refs[1:1 + n_layers]
        b_refs = refs[1 + n_layers:1 + 2 * n_layers]
        o_ref = refs[1 + 2 * n_layers]

        h = x_ref[...]                                   # (TB, Din_pad) f32
        # Small static layer count -> unrolled Python loop. Every layer is
        # Linear -> ReLU (ReLU after the last layer too, matching the module).
        for l in range(n_layers):
            # bf16 x bf16 -> MXU with f32 accumulate; bias add / ReLU in f32.
            y = jnp.dot(h.astype(jnp.bfloat16), w_refs[l][...],
                        preferred_element_type=jnp.float32)
            y = y + b_refs[l][...]                       # (1, Dout) broadcast
            h = jnp.maximum(y, 0.0)
        o_ref[...] = h.astype(o_ref.dtype)

    return kernel


def ffnn_fused(x_pad, w_list, b_list, *, tile_b):
    """All layers fused.

    x_pad:  (Bp, Din_pad) f32, Bp % tile_b == 0
    w_list: per-layer (Din_pad_l, Dout_pad_l) bf16 (pre-transposed, zero-padded)
    b_list: per-layer (1, Dout_pad_l) f32 (zero-padded)
    """
    Bp, din = x_pad.shape
    L = len(w_list)
    dout = w_list[-1].shape[1]
    assert Bp % tile_b == 0
    grid = (Bp // tile_b,)

    # Weights/biases have a constant index_map -> single VMEM buffer each.
    w_specs = [
        pl.BlockSpec(w.shape, lambda i: (0, 0), pipeline_mode=pl.Buffered(1))
        for w in w_list
    ]
    b_specs = [
        pl.BlockSpec(b.shape, lambda i: (0, 0), pipeline_mode=pl.Buffered(1))
        for b in b_list
    ]

    w_bytes = sum(w.size * w.dtype.itemsize for w in w_list)
    b_bytes = sum(b.size * b.dtype.itemsize for b in b_list)

    # Advisory cost estimate (real padded shapes).
    flops = 2 * Bp * sum(w.shape[0] * w.shape[1] for w in w_list)
    bytes_accessed = x_pad.size * 4 + Bp * dout * 4 + w_bytes + b_bytes

    # VMEM budget: single-buffered weights/biases, double-buffered in/out
    # batch tiles, live f32 activation intermediates, plus slack.
    max_d = max([din] + [w.shape[1] for w in w_list])
    vmem_bytes = (w_bytes + b_bytes
                  + 2 * tile_b * din * 4
                  + 2 * tile_b * dout * 4
                  + (L + 2) * tile_b * max_d * 4
                  + (2 << 20))
    vmem_bytes = int(min(max(vmem_bytes, 16 << 20), 64 << 20))

    return pl.pallas_call(
        _make_ffnn_kernel(L),
        out_shape=jax.ShapeDtypeStruct((Bp, dout), jnp.float32),
        grid_spec=pltpu.PrefetchScalarGridSpec(
            num_scalar_prefetch=0,
            grid=grid,
            in_specs=[pl.BlockSpec((tile_b, din), lambda i: (i, 0))]
                     + w_specs + b_specs,
            out_specs=pl.BlockSpec((tile_b, dout), lambda i: (i, 0)),
        ),
        compiler_params=pltpu.CompilerParams(
            dimension_semantics=("parallel",),
            vmem_limit_bytes=vmem_bytes),
        cost_estimate=pl.CostEstimate(
            flops=int(flops), transcendentals=0,
            bytes_accessed=int(bytes_accessed)),
    )(x_pad, *w_list, *b_list)


# ----------------------------------------------------------------------------
# Parameter init (mimics nn.Linear) and one-time prepare (transpose/pad/cast).
# ----------------------------------------------------------------------------
def init_ffnn_params(key, input_size, hidden_size, n_hidden, n_outputs):
    """Deterministic init mimicking nn.Linear's U(-1/sqrt(fan_in), 1/sqrt(fan_in))."""
    h_sizes = [input_size] + [hidden_size] * n_hidden + [n_outputs]
    params = []
    for k in range(len(h_sizes) - 1):
        fan_in, fan_out = h_sizes[k], h_sizes[k + 1]
        key, kw, kb = jax.random.split(key, 3)
        bound = 1.0 / (fan_in ** 0.5)
        w = jax.random.uniform(kw, (fan_out, fan_in), jnp.float32, -bound, bound)
        b = jax.random.uniform(kb, (fan_out,), jnp.float32, -bound, bound)
        params.append((w, b))
    return params


def prepare_ffnn_params(params):
    """One-time prep per layer: transpose each weight to (in, out), zero-pad
    each feature dim to its OWN multiple of 128 (lane-dense, no global-max
    waste), cast weights to bf16 (weight-bandwidth-bound regime), keep biases
    f32 so the bias add / padded-lane zeros stay exact."""
    w_list, b_list = [], []
    for w, b in params:
        fan_out, fan_in = w.shape
        din = _round_up(fan_in, _LANE)
        dout = _round_up(fan_out, _LANE)
        w_t = jnp.zeros((din, dout), jnp.float32).at[:fan_in, :fan_out].set(w.T)
        w_list.append(w_t.astype(jnp.bfloat16))
        b_list.append(jnp.zeros((1, dout), jnp.float32).at[:, :fan_out].set(b))
    return w_list, b_list


def _choose_batch_tiling(B):
    """Pick (padded_batch, tile_b): >=2 grid steps when Bp >= 16 (v7x megacore),
    tile cap 512 (fills a 256x256 MXU), and <= ~12.5% zero-row padding."""
    Bp = _round_up(B, _SUBLANE)
    if Bp < 16:
        return Bp, Bp
    cap = 512
    tile_b = min(cap, _round_up((Bp + 1) // 2, _SUBLANE))
    while tile_b > _SUBLANE and (_round_up(Bp, tile_b) - Bp) * 8 > Bp:
        tile_b = _round_up(tile_b // 2, _SUBLANE)
    return _round_up(Bp, tile_b), tile_b


@functools.partial(jax.jit, static_argnames=("n_inputs", "n_outputs"))
def ffnn_forward(x, w_list, b_list, *, n_inputs, n_outputs):
    """x: (B, n_inputs) -> (B, n_outputs). Padding / slicing are cheap edge
    ops; all per-layer work happens inside the single fused Pallas kernel."""
    B = x.shape[0]
    din = w_list[0].shape[0]
    Bp, tile_b = _choose_batch_tiling(B)
    x_pad = jnp.zeros((Bp, din), jnp.float32).at[:B, :n_inputs].set(
        x.astype(jnp.float32))
    y_pad = ffnn_fused(x_pad, tuple(w_list), tuple(b_list), tile_b=tile_b)
    return y_pad[:B, :n_outputs]


if __name__ == "__main__":
    # Small shapes consistent with the module: FFNN(input_size=32, hidden=32,
    # n_hidden=2, n_outputs=16), batch=8.
    input_size, hidden_size, n_hidden, n_outputs = 32, 32, 2, 16
    batch = 8

    key = jax.random.PRNGKey(0)
    key, kx = jax.random.split(key)
    x = jax.random.normal(kx, (batch, input_size), jnp.float32)

    params = init_ffnn_params(key, input_size, hidden_size, n_hidden, n_outputs)
    w_list, b_list = prepare_ffnn_params(params)

    out = ffnn_forward(x, w_list, b_list,
                       n_inputs=input_size, n_outputs=n_outputs)
    out = jax.block_until_ready(out)

    # Reference: exact f32 forward of the PyTorch module (Linear -> ReLU every
    # layer, including the last).
    ref = x
    for w, b in params:
        ref = jnp.maximum(ref @ w.T + b, 0.0)

    assert out.shape == (batch, n_outputs)
    # Weights live in bf16 inside the kernel (f32 accumulate), so compare to
    # the pure-f32 reference at bf16-level tolerance.
    err = float(jnp.max(jnp.abs(out - ref)))
    assert jnp.allclose(out, ref, atol=2e-2, rtol=2e-2), err

    print("KERNEL_OK")
</pallas_src>

<mosaic_0001>
module attributes {stable_mosaic.version = 11 : i64} {
  func.func @kernel(%arg0: i32, %arg1: memref<8x128xf32, #tpu.memory_space<vmem>>, %arg2: memref<128x128xbf16, #tpu.memory_space<vmem>>, %arg3: memref<128x128xbf16, #tpu.memory_space<vmem>>, %arg4: memref<128x128xbf16, #tpu.memory_space<vmem>>, %arg5: memref<1x128xf32, #tpu.memory_space<vmem>>, %arg6: memref<1x128xf32, #tpu.memory_space<vmem>>, %arg7: memref<1x128xf32, #tpu.memory_space<vmem>>, %arg8: memref<8x128xf32, #tpu.memory_space<vmem>>) attributes {dimension_semantics = [#tpu.dimension_semantics<parallel>], iteration_bounds = array<i64: 1>, scalar_prefetch = 0 : i64, scratch_operands = 0 : i64, tpu.core_type = #tpu.core_type<tc>, window_params = [{transform_indices = @transform_0, window_bounds = array<i64: 8, 128>}, {pipeline_mode = #tpu.pipeline_mode<synchronous>, transform_indices = @transform_1, window_bounds = array<i64: 128, 128>}, {pipeline_mode = #tpu.pipeline_mode<synchronous>, transform_indices = @transform_2, window_bounds = array<i64: 128, 128>}, {pipeline_mode = #tpu.pipeline_mode<synchronous>, transform_indices = @transform_3, window_bounds = array<i64: 128, 128>}, {pipeline_mode = #tpu.pipeline_mode<synchronous>, transform_indices = @transform_4, window_bounds = array<i64: 1, 128>}, {pipeline_mode = #tpu.pipeline_mode<synchronous>, transform_indices = @transform_5, window_bounds = array<i64: 1, 128>}, {pipeline_mode = #tpu.pipeline_mode<synchronous>, transform_indices = @transform_6, window_bounds = array<i64: 1, 128>}, {transform_indices = @transform_7, window_bounds = array<i64: 8, 128>}]} {
    %c0 = arith.constant 0 : index
    %c0_0 = arith.constant 0 : index
    %0 = vector.load %arg1[%c0, %c0_0] : memref<8x128xf32, #tpu.memory_space<vmem>>, vector<8x128xf32>
    %1 = arith.truncf %0 : vector<8x128xf32> to vector<8x128xbf16>
    %c0_1 = arith.constant 0 : index
    %c0_2 = arith.constant 0 : index
    %2 = vector.load %arg2[%c0_1, %c0_2] : memref<128x128xbf16, #tpu.memory_space<vmem>>, vector<128x128xbf16>
    %cst = arith.constant dense<0.000000e+00> : vector<8x128xf32>
    %3 = tpu.matmul %1, %2, %cst {dimension_numbers = #tpu.dot_dimension_numbers<[1], [0], [0], [1], [0, 0, 1, 1], [], []>} : vector<8x128xbf16>, vector<128x128xbf16>, vector<8x128xf32> -> vector<8x128xf32>
    %c0_3 = arith.constant 0 : index
    %c0_4 = arith.constant 0 : index
    %4 = vector.load %arg5[%c0_3, %c0_4] : memref<1x128xf32, #tpu.memory_space<vmem>>, vector<1x128xf32>
    %5 = vector.broadcast %4 : vector<1x128xf32> to vector<8x128xf32>
    %6 = arith.addf %3, %5 : vector<8x128xf32>
    %cst_5 = arith.constant 0.000000e+00 : f32
    %7 = vector.broadcast %cst_5 : f32 to vector<8x128xf32>
    %8 = arith.maximumf %6, %7 : vector<8x128xf32>
    %9 = arith.truncf %8 : vector<8x128xf32> to vector<8x128xbf16>
    %c0_6 = arith.constant 0 : index
    %c0_7 = arith.constant 0 : index
    %10 = vector.load %arg3[%c0_6, %c0_7] : memref<128x128xbf16, #tpu.memory_space<vmem>>, vector<128x128xbf16>
    %cst_8 = arith.constant dense<0.000000e+00> : vector<8x128xf32>
    %11 = tpu.matmul %9, %10, %cst_8 {dimension_numbers = #tpu.dot_dimension_numbers<[1], [0], [0], [1], [0, 0, 1, 1], [], []>} : vector<8x128xbf16>, vector<128x128xbf16>, vector<8x128xf32> -> vector<8x128xf32>
    %c0_9 = arith.constant 0 : index
    %c0_10 = arith.constant 0 : index
    %12 = vector.load %arg6[%c0_9, %c0_10] : memref<1x128xf32, #tpu.memory_space<vmem>>, vector<1x128xf32>
    %13 = vector.broadcast %12 : vector<1x128xf32> to vector<8x128xf32>
    %14 = arith.addf %11, %13 : vector<8x128xf32>
    %cst_11 = arith.constant 0.000000e+00 : f32
    %15 = vector.broadcast %cst_11 : f32 to vector<8x128xf32>
    %16 = arith.maximumf %14, %15 : vector<8x128xf32>
    %17 = arith.truncf %16 : vector<8x128xf32> to vector<8x128xbf16>
    %c0_12 = arith.constant 0 : index
    %c0_13 = arith.constant 0 : index
    %18 = vector.load %arg4[%c0_12, %c0_13] : memref<128x128xbf16, #tpu.memory_space<vmem>>, vector<128x128xbf16>
    %cst_14 = arith.constant dense<0.000000e+00> : vector<8x128xf32>
    %19 = tpu.matmul %17, %18, %cst_14 {dimension_numbers = #tpu.dot_dimension_numbers<[1], [0], [0], [1], [0, 0, 1, 1], [], []>} : vector<8x128xbf16>, vector<128x128xbf16>, vector<8x128xf32> -> vector<8x128xf32>
    %c0_15 = arith.constant 0 : index
    %c0_16 = arith.constant 0 : index
    %20 = vector.load %arg7[%c0_15, %c0_16] : memref<1x128xf32, #tpu.memory_space<vmem>>, vector<1x128xf32>
    %21 = vector.broadcast %20 : vector<1x128xf32> to vector<8x128xf32>
    %22 = arith.addf %19, %21 : vector<8x128xf32>
    %cst_17 = arith.constant 0.000000e+00 : f32
    %23 = vector.broadcast %cst_17 : f32 to vector<8x128xf32>
    %24 = arith.maximumf %22, %23 : vector<8x128xf32>
    %c0_18 = arith.constant 0 : index
    %c0_19 = arith.constant 0 : index
    %25 = vector.load %arg8[%c0_18, %c0_19] : memref<8x128xf32, #tpu.memory_space<vmem>>, vector<8x128xf32>
    tpu.vector_store %arg8[%c0_18, %c0_19], %24 {strides = array<i32>} : memref<8x128xf32, #tpu.memory_space<vmem>>, vector<8x128xf32>,
    return
  }
  func.func @transform_0(%arg0: i32) -> (i32, i32) {
    %c0_i32 = arith.constant 0 : i32
    %c0_i32_0 = arith.constant 0 : i32
    return %arg0, %c0_i32 : i32, i32
  }
  func.func @transform_1(%arg0: i32) -> (i32, i32) {
    %c0_i32 = arith.constant 0 : i32
    %c0_i32_0 = arith.constant 0 : i32
    %c0_i32_1 = arith.constant 0 : i32
    return %c0_i32, %c0_i32_0 : i32, i32
  }
  func.func @transform_2(%arg0: i32) -> (i32, i32) {
    %c0_i32 = arith.constant 0 : i32
    %c0_i32_0 = arith.constant 0 : i32
    %c0_i32_1 = arith.constant 0 : i32
    return %c0_i32, %c0_i32_0 : i32, i32
  }
  func.func @transform_3(%arg0: i32) -> (i32, i32) {
    %c0_i32 = arith.constant 0 : i32
    %c0_i32_0 = arith.constant 0 : i32
    %c0_i32_1 = arith.constant 0 : i32
    return %c0_i32, %c0_i32_0 : i32, i32
  }
  func.func @transform_4(%arg0: i32) -> (i32, i32) {
    %c0_i32 = arith.constant 0 : i32
    %c0_i32_0 = arith.constant 0 : i32
    %c0_i32_1 = arith.constant 0 : i32
    return %c0_i32, %c0_i32_0 : i32, i32
  }
  func.func @transform_5(%arg0: i32) -> (i32, i32) {
    %c0_i32 = arith.constant 0 : i32
    %c0_i32_0 = arith.constant 0 : i32
    %c0_i32_1 = arith.constant 0 : i32
    return %c0_i32, %c0_i32_0 : i32, i32
  }
  func.func @transform_6(%arg0: i32) -> (i32, i32) {
    %c0_i32 = arith.constant 0 : i32
    %c0_i32_0 = arith.constant 0 : i32
    %c0_i32_1 = arith.constant 0 : i32
    return %c0_i32, %c0_i32_0 : i32, i32
  }
  func.func @transform_7(%arg0: i32) -> (i32, i32) {
    %c0_i32 = arith.constant 0 : i32
    %c0_i32_0 = arith.constant 0 : i32
    return %arg0, %c0_i32 : i32, i32
  }
}

</mosaic_0001>

<bundles_post_ra>
// kernel: ffnn_forward.1
= control target key start
LH: loop header
LB: loop body
LE: loop exit
PB: predicated region body
PF: predicated region fallthrough
CT: control target
= control target key end

     0   :  { %12 = vsyncpa [#allocation3], 0  ;;  %s820_s0 = inlined_call_operand.vmem [shape: f32[8,128], index: 0, kind: input, shape index: {}]   ;;  %s821_s1 = inlined_call_operand.hbm [shape: bf16[128,128], index: 1, kind: input, shape index: {}]   ;;  %s822_s2 = inlined_call_operand.hbm [shape: bf16[128,128], index: 2, kind: input, shape index: {}]   ;;  %s823_s3 = inlined_call_operand.hbm [shape: bf16[128,128], index: 3, kind: input, shape index: {}]   ;;  %s824_s4 = inlined_call_operand.vmem [shape: f32[1,128], index: 4, kind: input, shape index: {}]   ;;  %s825_s5 = inlined_call_operand.vmem [shape: f32[1,128], index: 5, kind: input, shape index: {}]   ;;  %s826_s6 = inlined_call_operand.vmem [shape: f32[1,128], index: 6, kind: input, shape index: {}]   ;;  %s827_s7 = inlined_call_operand.hbm [shape: f32[8,128], index: 7, kind: output, shape index: {}]  }
   0x1   :  { %13 = vsyncpa [#allocation6], 0 }
   0x2   :  { %14 = vsyncpa [#allocation4], 0  ;;  %s666_s24 = smov [#allocation5]   ;;  %s667_s26 = smov [#allocation2]  }
   0x3   :  { %s34_s25 = sshll.u32 %s666_s24, 4  ;;  %s22_s27 = sshll.u32 %s667_s26, 4  ;;  %s35_s25 = int_to_ptr.vmem [resolvable:$true] %s34_s25  ;;  %s714_s27 = int_to_ptr.vmem [resolvable:$true] %s22_s27 }
   0x4   :  { %s572_s30 = scalar_lea.hbm %s822_s2, 1024 }
   0x5   :  { %p573_p0 = scmp.ne.s32.totalorder %s822_s2, %s572_s30  ;;  %p576_p1 = scmp.lt.u32.totalorder %s572_s30, %s822_s2 }
   0x7   :  { %p578_p2 = pnand %p576_p1, %p573_p0 }
   0x9   :  { %581 = shalt.err (!%p578_p2)
}
   0xa   :  { %s582_s12 = scalar_lea.vmem %s35_s25, 1024  ;;  %p587_p4 = scmp.lt.s32.totalorder %s35_s25, %s35_s25 }
   0xb   :  { %p583_p3 = scmp.ne.s32.totalorder %s35_s25, %s582_s12  ;;  %p588_p5 = scmp.lt.s32.totalorder %s582_s12, %s582_s12 }
   0xd   :  { %p589_p6 = por %p588_p5, %p587_p4 }
   0xf   :  { %p590_p7 = pnand %p589_p6, %p583_p3 }
  0x11   :  { %593 = shalt.err (!%p590_p7)
}
  0x12   :  { %s668_s13 = smov 64   ;;  %s669_s14 = smov 4  }
  0x13   :  { %40 = dma.hbm_to_vmem [thread:$0]  %s822_s2, 1024, %s35_s25, [#allocation6], %s668_s13, %s668_s13, %s669_s14  }
  0x14   :  { %s594_s19 = scalar_lea.hbm %s821_s1, 1024 }
  0x15   :  { %p595_p8 = scmp.ne.s32.totalorder %s821_s1, %s594_s19  ;;  %p598_p9 = scmp.lt.u32.totalorder %s594_s19, %s821_s1 }
  0x17   :  { %p600_p10 = pnand %p598_p9, %p595_p8 }
  0x19   :  { %603 = shalt.err (!%p600_p10)
}
  0x1a   :  { %s604_s24 = scalar_lea.vmem %s714_s27, 1024  ;;  %p609_p12 = scmp.lt.s32.totalorder %s714_s27, %s714_s27 }
  0x1b   :  { %p605_p11 = scmp.ne.s32.totalorder %s714_s27, %s604_s24  ;;  %p610_p13 = scmp.lt.s32.totalorder %s604_s24, %s604_s24 }
  0x1d   :  { %p611_p0 = por %p610_p13, %p609_p12 }
  0x1f   :  { %p612_p1 = pnand %p611_p0, %p605_p11 }
  0x21   :  { %615 = shalt.err (!%p612_p1)
}
  0x22   :  { %28 = dma.hbm_to_vmem [thread:$0]  %s821_s1, 1024, %s714_s27, [#allocation3], %s668_s13, %s668_s13, %s669_s14  }
  0x23   :  { %s670_s26 = smov [#allocation7]   ;;  %s616_s8 = scalar_lea.hbm %s823_s3, 1024 }
  0x24   :  { %s46_s28 = sshll.u32 %s670_s26, 4  ;;  %p617_p2 = scmp.ne.s32.totalorder %s823_s3, %s616_s8  ;;  %s47_s28 = int_to_ptr.vmem [resolvable:$true] %s46_s28 }
  0x25   :  { %p620_p3 = scmp.lt.u32.totalorder %s616_s8, %s823_s3 }
  0x27   :  { %p622_p4 = pnand %p620_p3, %p617_p2 }
  0x29   :  { %625 = shalt.err (!%p622_p4)
}
  0x2a   :  { %s626_s15 = scalar_lea.vmem %s47_s28, 1024  ;;  %p631_p6 = scmp.lt.s32.totalorder %s47_s28, %s47_s28 }
  0x2b   :  { %p627_p5 = scmp.ne.s32.totalorder %s47_s28, %s626_s15  ;;  %p632_p7 = scmp.lt.s32.totalorder %s626_s15, %s626_s15 }
  0x2d   :  { %p633_p8 = por %p632_p7, %p631_p6 }
  0x2f   :  { %p634_p9 = pnand %p633_p8, %p627_p5 }
  0x31   :  { %637 = shalt.err (!%p634_p9)
}
  0x32   :  { %52 = dma.hbm_to_vmem [thread:$0]  %s823_s3, 1024, %s47_s28, [#allocation6], %s668_s13, %s668_s13, %s669_s14  }
  0x33   :  { %660 = dma.done.wait [#allocation3], 1024  }
  0x34   :  { %661 = vsyncadd [#allocation3], 4294966272 }
  0x35   :  { %662 = dma.done.wait [#allocation6], 2048  }
  0x36   :  { %663 = vsyncadd [#allocation6], 4294965248  ;;  %v671_v0 = vmov 0.0   ;;  %vm672_vm0 = vmmov 0   ;;  %v548_v1 = vld [vmem:[#allocation2] sm:$0xff]   ;;  %v549_v2 = vld [vmem:[#allocation2 + $0x8] sm:$0xff]  }
  0x37   :  { %480 = vmatprep.subr.bf16.mxu0 %v671_v0  ;;  %496 = vmatprep.mubr.msk.bf16.mxu0 %vm672_vm0, %v671_v0  ;;  %v550_v3 = vld [vmem:[#allocation2 + $0x10] sm:$0xff]   ;;  %v556_v4 = vld [vmem:[#allocation5] sm:$0xff]   ;;  %v551_v5 = vld [vmem:[#allocation2 + $0x18] sm:$0xff]   ;;  %s673_s19 = smov [#allocation8]  }
  0x38   :  { %500 = vmatprep.subr.bf16.mxu1 %v671_v0  ;;  %516 = vmatprep.mubr.msk.bf16.mxu1 %vm672_vm0, %v671_v0  ;;  %v557_v6 = vld [vmem:[#allocation5 + $0x8] sm:$0xff]   ;;  %v552_v7 = vld [vmem:[#allocation2 + $0x20] sm:$0xff]   ;;  %v558_v8 = vld [vmem:[#allocation5 + $0x10] sm:$0xff]   ;;  %s416_s20 = sshll.u32 %s673_s19, 4  ;;  %s417_s20 = int_to_ptr.vmem [resolvable:$true] %s416_s20 }
  0x39   :  { %481 = vmatpush3.bf16.msra.mxu0 %v548_v1  ;;  %501 = vmatpush3.bf16.msra.mxu1 %v556_v4  ;;  %v553_v9 = vld [vmem:[#allocation2 + $0x28] sm:$0xff]   ;;  %v559_v10 = vld [vmem:[#allocation5 + $0x18] sm:$0xff]   ;;  %v554_v11 = vld [vmem:[#allocation2 + $0x30] sm:$0xff]   ;;  %p643_p11 = scmp.lt.s32.totalorder %s417_s20, %s417_s20 }
  0x3a   :  { %482 = vmatprep.subr.bf16.mxu0 %v671_v0  ;;  %502 = vmatprep.subr.bf16.mxu1 %v671_v0  ;;  %v560_v12 = vld [vmem:[#allocation5 + $0x20] sm:$0xff]   ;;  %v555_v13 = vld [vmem:[#allocation2 + $0x38] sm:$0xff]   ;;  %v561_v15 = vld [vmem:[#allocation5 + $0x28] sm:$0xff]  }
  0x3b   :  { %v69_v14 = vld [vmem:[%s820_s0] sm:$0xff]  ;;  %v562_v17 = vld [vmem:[#allocation5 + $0x30] sm:$0xff]   ;;  %v563_v18 = vld [vmem:[#allocation5 + $0x38] sm:$0xff]  }
  0x3c   :  { %v70_v16 = vpack.c.bf16 %v69_v14, %v69_v14  ;;  %v564_v19 = vld [vmem:[#allocation7] sm:$0xff]   ;;  %v565_v20 = vld [vmem:[#allocation7 + $0x8] sm:$0xff]   ;;  %v566_v21 = vld [vmem:[#allocation7 + $0x10] sm:$0xff]  }
  0x3d   :  { %483 = vmatpush3.bf16.msra.mxu0 %v549_v2  ;;  %503 = vmatpush3.bf16.msra.mxu1 %v557_v6  ;;  %v567_v22 = vld [vmem:[#allocation7 + $0x18] sm:$0xff]   ;;  %v568_v23 = vld [vmem:[#allocation7 + $0x20] sm:$0xff]   ;;  %v569_v24 = vld [vmem:[#allocation7 + $0x28] sm:$0xff]  }
  0x3e   :  { %484 = vmatprep.subr.bf16.mxu0 %v671_v0  ;;  %504 = vmatprep.subr.bf16.mxu1 %v671_v0  ;;  %v426_v25 = vld [vmem:[%s824_s4] ss:$0 sm:$0xff]  ;;  %v570_v33 = vld [vmem:[#allocation7 + $0x30] sm:$0xff]   ;;  %v571_v34 = vld [vmem:[#allocation7 + $0x38] sm:$0xff]  }
  0x3f   :  { %v435_v35 = vld [vmem:[%s825_s5] ss:$0 sm:$0xff]  ;;  %s638_s5 = scalar_lea.vmem %s417_s20, 128 }
  0x40   :  { %v444_v43 = vld [vmem:[%s826_s6] ss:$0 sm:$0xff]  ;;  %p639_p10 = scmp.ne.s32.totalorder %s417_s20, %s638_s5  ;;  %p644_p12 = scmp.lt.s32.totalorder %s638_s5, %s638_s5 }
  0x41   :  { %485 = vmatpush3.bf16.msra.mxu0 %v550_v3  ;;  %505 = vmatpush3.bf16.msra.mxu1 %v558_v8 }
  0x42   :  { %486 = vmatprep.subr.bf16.mxu0 %v671_v0  ;;  %506 = vmatprep.subr.bf16.mxu1 %v671_v0  ;;  %p645_p13 = por %p644_p12, %p643_p11 }
  0x44   :  { %p646_p0 = pnand %p645_p13, %p639_p10 }
  0x45   :  { %487 = vmatpush3.bf16.msra.mxu0 %v551_v5  ;;  %507 = vmatpush3.bf16.msra.mxu1 %v559_v10 }
  0x46   :  { %488 = vmatprep.subr.bf16.mxu0 %v671_v0  ;;  %508 = vmatprep.subr.bf16.mxu1 %v671_v0 }
  0x49   :  { %489 = vmatpush3.bf16.msra.mxu0 %v552_v7  ;;  %509 = vmatpush3.bf16.msra.mxu1 %v560_v12 }
  0x4a   :  { %490 = vmatprep.subr.bf16.mxu0 %v671_v0  ;;  %510 = vmatprep.subr.bf16.mxu1 %v671_v0 }
  0x4d   :  { %491 = vmatpush3.bf16.msra.mxu0 %v553_v9  ;;  %511 = vmatpush3.bf16.msra.mxu1 %v561_v15 }
  0x4e   :  { %492 = vmatprep.subr.bf16.mxu0 %v671_v0  ;;  %512 = vmatprep.subr.bf16.mxu1 %v671_v0 }
  0x51   :  { %493 = vmatpush3.bf16.msra.mxu0 %v554_v11  ;;  %513 = vmatpush3.bf16.msra.mxu1 %v562_v17 }
  0x52   :  { %494 = vmatprep.subr.bf16.mxu0 %v671_v0  ;;  %514 = vmatprep.subr.bf16.mxu1 %v671_v0 }
  0x55   :  { %495 = vmatpush3.bf16.msra.mxu0 %v555_v13  ;;  %515 = vmatpush3.bf16.msra.mxu1 %v563_v18 }
  0x56   :  { %520 = vmatprep.subr.bf16.mxu0 %v671_v0 }
  0x58   :  { %497 = vmatmul.mubr.bf16.vlgmr.msra.gmra.mrb[0].mxu0 %v70_v16 }
  0x59   :  { %536 = vmatprep.mubr.msk.bf16.mxu0 %vm672_vm0, %v671_v0  ;;  %521 = vmatpush3.bf16.msra.mxu0 %v564_v19 }
  0x5a   :  { %522 = vmatprep.subr.bf16.mxu0 %v671_v0 }
  0x5d   :  { %523 = vmatpush3.bf16.msra.mxu0 %v565_v20 }
  0x5e   :  { %524 = vmatprep.subr.bf16.mxu0 %v671_v0 }
  0x61   :  { %525 = vmatpush3.bf16.msra.mxu0 %v566_v21 }
  0x62   :  { %526 = vmatprep.subr.bf16.mxu0 %v671_v0 }
  0x65   :  { %527 = vmatpush3.bf16.msra.mxu0 %v567_v22 }
  0x66   :  { %528 = vmatprep.subr.bf16.mxu0 %v671_v0 }
  0x69   :  { %529 = vmatpush3.bf16.msra.mxu0 %v568_v23 }
  0x6a   :  { %530 = vmatprep.subr.bf16.mxu0 %v671_v0 }
  0x6d   :  { %531 = vmatpush3.bf16.msra.mxu0 %v569_v24 }
  0x6e   :  { %532 = vmatprep.subr.bf16.mxu0 %v671_v0 }
  0x71   :  { %533 = vmatpush3.bf16.msra.mxu0 %v570_v33 }
  0x72   :  { %534 = vmatprep.subr.bf16.mxu0 %v671_v0 }
  0x75   :  { %535 = vmatpush3.bf16.msra.mxu0 %v571_v34 }
 0x12b   :  { %v176_v26 = vpop.f32.mrb[0].mxu0 }
 0x12c   :  { %v177_v27 = vadd.f32 %v426_v25, %v176_v26  ;;  %v498_v28 = vpop.f32.mrb[1].mxu0 }
 0x12d   :  { %v179_v29 = vpop.f32.mrb[2].mxu0 }
 0x12e   :  { %v182_v30 = vmax.f32 %v177_v27, 0.0  ;;  %v499_v31 = vpop.f32.mrb[3].mxu0 }
 0x130   :  { %v183_v32 = vpack.c.bf16 %v182_v30, %v182_v30 }
 0x132   :  { %517 = vmatmul.mubr.bf16.vlgmr.msra.gmra.mrb[0].mxu1 %v183_v32 }
 0x205   :  { %v289_v36 = vpop.f32.mrb[0].mxu1 }
 0x206   :  { %v290_v37 = vadd.f32 %v435_v35, %v289_v36  ;;  %v518_v38 = vpop.f32.mrb[1].mxu1 }
 0x207   :  { %v292_v39 = vpop.f32.mrb[2].mxu1 }
 0x208   :  { %v295_v40 = vmax.f32 %v290_v37, 0.0  ;;  %v519_v41 = vpop.f32.mrb[3].mxu1 }
 0x20a   :  { %v296_v42 = vpack.c.bf16 %v295_v40, %v295_v40 }
 0x20c   :  { %537 = vmatmul.mubr.bf16.vlgmr.msra.gmra.mrb[4].mxu0 %v296_v42 }
 0x2df   :  { %v402_v44 = vpop.f32.mrb[4].mxu0 }
 0x2e0   :  { %v403_v45 = vadd.f32 %v444_v43, %v402_v44  ;;  %v538_v46 = vpop.f32.mrb[5].mxu0 }
 0x2e1   :  { %v405_v47 = vpop.f32.mrb[6].mxu0 }
 0x2e2   :  { %v408_v48 = vmax.f32 %v403_v45, 0.0  ;;  %v539_v49 = vpop.f32.mrb[7].mxu0 }
 0x2e4   :  { %409 = vst [vmem:[#allocation8] sm:$0xff] %v408_v48 }
 0x2e5   :  { %649 = shalt.err (!%p646_p0)
}
 0x2e6   :  { %s650_s6 = scalar_lea.hbm %s827_s7, 128 }
 0x2e7   :  { %p651_p1 = scmp.ne.s32.totalorder %s827_s7, %s650_s6  ;;  %p654_p2 = scmp.lt.u32.totalorder %s650_s6, %s827_s7 }
 0x2e9   :  { %p656_p3 = pnand %p654_p2, %p651_p1 }
 0x2eb   :  { %659 = shalt.err (!%p656_p3)
}
 0x2ec   :  { %419 = dma.vmem_to_hbm [thread:$0]  %s417_s20, 128, %s827_s7, [#allocation4]  }
 0x2ed   :  { %664 = dma.done.wait [#allocation4], 128  }
 0x2ee   :  { %665 = vsyncadd [#allocation4], 4294967168 }
 0x2ef   :  { %423 = vsyncpa [#allocation3], 1 }
 0x2f0   :  { %424 = vsyncpa [#allocation6], 1 }
 0x2f1   :  { %425 = vsyncpa [#allocation4], 1 }

</bundles_post_ra>
